<compile_context>
chip_gen: v6e
topology: v6e:2x2x1
jax: 0.10.0
libtpu: 0.0.40
codegen_flags: <defaults>
</compile_context>

<pallas_src>
import jax
import jax.numpy as jnp
from jax.experimental import pallas as pl
from jax.experimental.pallas import tpu as pltpu

_LANES = 128
_SUBLANES = 8
_BLOCK_ROWS = 1024  # 1024 * 128 * 4B = 512 KiB per input per pipeline buffer


def _make_mse_partial_kernel(rows: int, block_rows: int, needs_mask: bool):
    """Kernel producing one (8, 128) f32 partial sum of squared diffs per block."""

    def kernel(sr_ref, hr_ref, out_ref):
        d = sr_ref[...].astype(jnp.float32) - hr_ref[...].astype(jnp.float32)
        if needs_mask:
            i = pl.program_id(0)
            row = jax.lax.broadcasted_iota(jnp.int32, (block_rows, _LANES), 0)
            d = jnp.where(i * block_rows + row < rows, d, 0.0)
        dsq = d * d
        # Reduce only along the block-row-group axis (vreg adds, pure VPU).
        out_ref[...] = jnp.sum(
            dsq.reshape(block_rows // _SUBLANES, _SUBLANES, _LANES), axis=0
        )

    return kernel


def content_loss(sr: jax.Array, hr: jax.Array) -> jax.Array:
    """MSE loss (mean over all elements), matching F.mse_loss(sr, hr)."""
    assert sr.shape == hr.shape, "sr/hr must have identical shapes"
    n = sr.size

    sr_flat = sr.reshape(-1)
    hr_flat = hr.reshape(-1)

    tile = _SUBLANES * _LANES  # 1024 elements
    n_main = (n // tile) * tile
    rem = n - n_main

    total = jnp.float32(0.0)

    if n_main:
        if rem:
            # TODO(synk): the prefix slice may materialize a copy when n is not
            # a multiple of 1024; typical image-batch sizes take the no-slice path.
            sr_main = sr_flat[:n_main]
            hr_main = hr_flat[:n_main]
        else:
            sr_main = sr_flat
            hr_main = hr_flat

        rows = n_main // _LANES              # multiple of 8
        sr2d = sr_main.reshape(rows, _LANES)  # free reshape
        hr2d = hr_main.reshape(rows, _LANES)

        block_rows = min(_BLOCK_ROWS, rows)
        needs_mask = (rows % block_rows) != 0
        num_blocks = pl.cdiv(rows, block_rows)

        partials = pl.pallas_call(
            _make_mse_partial_kernel(rows, block_rows, needs_mask),
            out_shape=jax.ShapeDtypeStruct(
                (num_blocks, _SUBLANES, _LANES), jnp.float32
            ),
            grid_spec=pltpu.PrefetchScalarGridSpec(
                num_scalar_prefetch=0,
                grid=(num_blocks,),
                in_specs=[
                    pl.BlockSpec((block_rows, _LANES), lambda i: (i, 0)),
                    pl.BlockSpec((block_rows, _LANES), lambda i: (i, 0)),
                ],
                out_specs=pl.BlockSpec(
                    (None, _SUBLANES, _LANES), lambda i: (i, 0, 0)
                ),
            ),
            compiler_params=pltpu.CompilerParams(
                dimension_semantics=("parallel",)
            ),
        )(sr2d, hr2d)

        total = total + jnp.sum(partials, dtype=jnp.float32)

    if rem:
        # Tiny ragged tail (< 1024 elements) handled in plain JAX.
        dt = sr_flat[n_main:].astype(jnp.float32) - hr_flat[n_main:].astype(
            jnp.float32
        )
        total = total + jnp.sum(dt * dt)

    return total / jnp.float32(n)


def _check(shape, key):
    k_sr, k_hr = jax.random.split(key)
    sr = jax.random.normal(k_sr, shape, dtype=jnp.float32)
    hr = jax.random.normal(k_hr, shape, dtype=jnp.float32)
    loss = content_loss(sr, hr)
    jax.block_until_ready(loss)
    ref = jnp.mean((sr - hr) ** 2)
    assert jnp.allclose(loss, ref, rtol=1e-5, atol=1e-6), (shape, loss, ref)


if __name__ == "__main__":
    key = jax.random.PRNGKey(0)
    k1, k2, k3 = jax.random.split(key, 3)

    # NCHW, like the PyTorch module's SR / HR image tensors.
    _check((2, 4, 16, 16), k1)      # single exact block
    _check((2, 3, 160, 160), k2)    # multi-block + masked ragged last block
    _check((2, 3, 17, 19), k3)      # kernel main part + pure-JAX tail

    print("KERNEL_OK")
</pallas_src>

<mosaic_0001>
module attributes {stable_mosaic.version = 11 : i64} {
  func.func @kernel(%arg0: i32, %arg1: memref<16x128xf32, #tpu.memory_space<vmem>>, %arg2: memref<16x128xf32, #tpu.memory_space<vmem>>, %arg3: memref<1x8x128xf32, #tpu.memory_space<vmem>>) attributes {dimension_semantics = [#tpu.dimension_semantics<parallel>], iteration_bounds = array<i64: 1>, scalar_prefetch = 0 : i64, scratch_operands = 0 : i64, tpu.core_type = #tpu.core_type<tc>, window_params = [{transform_indices = @transform_0, window_bounds = array<i64: 16, 128>}, {transform_indices = @transform_1, window_bounds = array<i64: 16, 128>}, {transform_indices = @transform_2, window_bounds = array<i64: 1, 8, 128>}]} {
    %c0 = arith.constant 0 : index
    %c0_0 = arith.constant 0 : index
    %0 = vector.load %arg1[%c0, %c0_0] : memref<16x128xf32, #tpu.memory_space<vmem>>, vector<16x128xf32>
    %c0_1 = arith.constant 0 : index
    %c0_2 = arith.constant 0 : index
    %1 = vector.load %arg2[%c0_1, %c0_2] : memref<16x128xf32, #tpu.memory_space<vmem>>, vector<16x128xf32>
    %2 = arith.subf %0, %1 : vector<16x128xf32>
    %3 = arith.mulf %2, %2 : vector<16x128xf32>
    %4 = vector.shape_cast %3 : vector<16x128xf32> to vector<2x8x128xf32>
    %cst = arith.constant dense<0.000000e+00> : vector<8x128xf32>
    %5 = vector.multi_reduction <add>, %4, %cst [0] : vector<2x8x128xf32> to vector<8x128xf32>
    %c0_3 = arith.constant 0 : index
    %c0_4 = arith.constant 0 : index
    %c0_5 = arith.constant 0 : index
    %6 = vector.load %arg3[%c0_3, %c0_4, %c0_5] : memref<1x8x128xf32, #tpu.memory_space<vmem>>, vector<1x8x128xf32>
    %7 = vector.shape_cast %6 : vector<1x8x128xf32> to vector<8x128xf32>
    %8 = vector.shape_cast %5 : vector<8x128xf32> to vector<1x8x128xf32>
    tpu.vector_store %arg3[%c0_3, %c0_4, %c0_5], %8 {strides = array<i32>} : memref<1x8x128xf32, #tpu.memory_space<vmem>>, vector<1x8x128xf32>,
    return
  }
  func.func @transform_0(%arg0: i32) -> (i32, i32) {
    %c0_i32 = arith.constant 0 : i32
    %c0_i32_0 = arith.constant 0 : i32
    return %arg0, %c0_i32 : i32, i32
  }
  func.func @transform_1(%arg0: i32) -> (i32, i32) {
    %c0_i32 = arith.constant 0 : i32
    %c0_i32_0 = arith.constant 0 : i32
    return %arg0, %c0_i32 : i32, i32
  }
  func.func @transform_2(%arg0: i32) -> (i32, i32, i32) {
    %c0_i32 = arith.constant 0 : i32
    %c0_i32_0 = arith.constant 0 : i32
    %c0_i32_1 = arith.constant 0 : i32
    return %arg0, %c0_i32, %c0_i32_0 : i32, i32, i32
  }
}

</mosaic_0001>

<bundles_post_ra>
// kernel: tpu_custom_call.1
= control target key start
LH: loop header
LB: loop body
LE: loop exit
PB: predicated region body
PF: predicated region fallthrough
CT: control target
= control target key end

     0   :  { %7 = vsyncpa [#allocation3], 0  ;;  %s166_s0 = inlined_call_operand.hbm [shape: f32[16,128], index: 0, kind: input, shape index: {}]   ;;  %s167_s1 = inlined_call_operand.hbm [shape: f32[16,128], index: 1, kind: input, shape index: {}]   ;;  %s168_s2 = inlined_call_operand.hbm [shape: f32[1,8,128], index: 2, kind: output, shape index: {}]  }
   0x1   :  { %8 = vsyncpa [#allocation6], 0 }
   0x2   :  { %9 = vsyncpa [#allocation4], 0  ;;  %s137_s9 = smov [#allocation2]  }
   0x3   :  { %s15_s10 = sshll.u32 %s137_s9, 4  ;;  %s16_s10 = int_to_ptr.vmem [resolvable:$true] %s15_s10 }
   0x4   :  { %s79_s11 = scalar_lea.vmem %s16_s10, 256  ;;  %p84_p1 = scmp.lt.s32.totalorder %s16_s10, %s16_s10 }
   0x5   :  { %p80_p0 = scmp.ne.s32.totalorder %s16_s10, %s79_s11  ;;  %p85_p2 = scmp.lt.s32.totalorder %s79_s11, %s79_s11 }
   0x7   :  { %p86_p3 = por %p85_p2, %p84_p1 }
   0x9   :  { %p87_p4 = pnand %p86_p3, %p80_p0 }
   0xb   :  { %90 = shalt.err (!%p87_p4)
}
   0xc   :  { %s138_s12 = smov 128   ;;  %s139_s13 = smov 8  }
   0xd   :  { %21 = dma.hbm_to_vmem [thread:$0]  %s166_s0, 256, %s16_s10, [#allocation3], %s138_s12, %s138_s12, %s139_s13  }
   0xe   :  { %s140_s16 = smov [#allocation5]  }
   0xf   :  { %s27_s17 = sshll.u32 %s140_s16, 4  ;;  %s28_s17 = int_to_ptr.vmem [resolvable:$true] %s27_s17 }
  0x10   :  { %s99_s18 = scalar_lea.vmem %s28_s17, 256  ;;  %p104_p6 = scmp.lt.s32.totalorder %s28_s17, %s28_s17 }
  0x11   :  { %p100_p5 = scmp.ne.s32.totalorder %s28_s17, %s99_s18  ;;  %p105_p7 = scmp.lt.s32.totalorder %s99_s18, %s99_s18 }
  0x13   :  { %p106_p8 = por %p105_p7, %p104_p6 }
  0x15   :  { %p107_p9 = pnand %p106_p8, %p100_p5 }
  0x17   :  { %110 = shalt.err (!%p107_p9)
}
  0x18   :  { %33 = dma.hbm_to_vmem [thread:$0]  %s167_s1, 256, %s28_s17, [#allocation6], %s138_s12, %s138_s12, %s139_s13  }
  0x19   :  { %131 = dma.done.wait [#allocation3], 256  }
  0x1a   :  { %132 = vsyncadd [#allocation3], 4294967040 }
  0x1b   :  { %133 = dma.done.wait [#allocation6], 256  }
  0x1c   :  { %134 = vsyncadd [#allocation6], 4294967040  ;;  %v40_v0 = vld [vmem:[#allocation2] sm:$0xff]  ;;  %v41_v1 = vld [vmem:[#allocation2 + $0x8] sm:$0xff]  ;;  %s141_s0 = smov [#allocation7]  }
  0x1d   :  { %v42_v2 = vld [vmem:[#allocation5] sm:$0xff]  ;;  %v43_v3 = vld [vmem:[#allocation5 + $0x8] sm:$0xff]  ;;  %s56_s21 = sshll.u32 %s141_s0, 4  ;;  %s57_s21 = int_to_ptr.vmem [resolvable:$true] %s56_s21 }
  0x1e   :  { %v44_v4 = vsub.f32 %v40_v0, %v42_v2  ;;  %v45_v5 = vsub.f32 %v41_v1, %v43_v3  ;;  %s111_s22 = scalar_lea.vmem %s57_s21, 128  ;;  %p116_p11 = scmp.lt.s32.totalorder %s57_s21, %s57_s21 }
  0x1f   :  { %p112_p10 = scmp.ne.s32.totalorder %s57_s21, %s111_s22  ;;  %p117_p12 = scmp.lt.s32.totalorder %s111_s22, %s111_s22 }
  0x20   :  { %v46_v6 = vmul.f32 %v44_v4, %v44_v4  ;;  %v47_v7 = vmul.f32 %v45_v5, %v45_v5 }
  0x21   :  { %p118_p13 = por %p117_p12, %p116_p11 }
  0x22   :  { %v48_v8 = vadd.f32 %v47_v7, %v46_v6 }
  0x23   :  { %p119_p0 = pnand %p118_p13, %p112_p10 }
  0x24   :  { %49 = vst [vmem:[#allocation7] sm:$0xff] %v48_v8 }
  0x25   :  { %122 = shalt.err (!%p119_p0)
}
  0x26   :  { %59 = dma.vmem_to_hbm [thread:$0]  %s57_s21, 128, %s168_s2, [#allocation4]  }
  0x27   :  { %135 = dma.done.wait [#allocation4], 128  }
  0x28   :  { %136 = vsyncadd [#allocation4], 4294967168 }
  0x29   :  { %63 = vsyncpa [#allocation3], 1 }
  0x2a   :  { %64 = vsyncpa [#allocation6], 1 }
  0x2b   :  { %65 = vsyncpa [#allocation4], 1 }

</bundles_post_ra>
